<compile_context>
chip_gen: v5e
topology: v5e:2x2
jax: 0.10.0
libtpu: 0.0.40
codegen_flags: <defaults>
</compile_context>

<pallas_src>
import functools
import math

import jax
import jax.numpy as jnp
from jax.experimental import pallas as pl
from jax.experimental.pallas import tpu as pltpu

_MIB = 1024 * 1024


def _round_up(n, m):
    return ((n + m - 1) // m) * m


@functools.lru_cache(maxsize=None)
def _tpu_traits():
    """Return (lane_align, usable_vmem_bytes) for the local TPU generation."""
    try:
        vmem_cap = int(pltpu.get_tpu_info().vmem_capacity_bytes)
    except Exception:
        vmem_cap = 64 * _MIB  # conservative (v7x-sized) fallback
    usable = max(32 * _MIB, min(int(vmem_cap * 0.85), vmem_cap - 12 * _MIB))
    lane_align = 128
    try:
        kind = jax.devices()[0].device_kind.lower()
        # v6e / v7x have 2x256x256 MXUs -> 256-lane feature alignment pays off.
        if not any(t in kind for t in ("v2", "v3", "v4", "v5")):
            lane_align = 256
    except Exception:
        pass
    return lane_align, usable


@functools.lru_cache(maxsize=None)
def _single_buffer_weights_supported():
    """One-time probe (NOT in the hot path): does pipeline_mode=pl.Buffered(1) lower?"""
    if not hasattr(pl, "Buffered"):
        return False

    def _copy(x_ref, o_ref):
        o_ref[...] = x_ref[...]

    try:
        f = pl.pallas_call(
            _copy,
            out_shape=jax.ShapeDtypeStruct((8, 128), jnp.float32),
            grid_spec=pltpu.PrefetchScalarGridSpec(
                num_scalar_prefetch=0,
                grid=(1,),
                in_specs=[pl.BlockSpec((8, 128), lambda i: (0, 0),
                                       pipeline_mode=pl.Buffered(1))],
                out_specs=pl.BlockSpec((8, 128), lambda i: (0, 0)),
            ),
        )
        jax.block_until_ready(f(jnp.zeros((8, 128), jnp.float32)))
        return True
    except Exception:
        return False


# ---------------------------------------------------------------------------
# Kernels
# ---------------------------------------------------------------------------
def _ffn_kernel_resident(x_ref, w1_ref, b1_ref, w2_ref, b2_ref, o_ref):
    # Weights fully resident in VMEM; one M-tile per grid step.
    x = x_ref[...].astype(w1_ref.dtype)
    h = jnp.dot(x, w1_ref[...], preferred_element_type=jnp.float32) + b1_ref[...]
    h = jnp.maximum(h, 0.0).astype(w2_ref.dtype)          # fused relu + cast
    y = jnp.dot(h, w2_ref[...], preferred_element_type=jnp.float32) + b2_ref[...]
    o_ref[...] = y.astype(o_ref.dtype)


def _ffn_kernel_di_tiled(x_ref, w1_ref, b1_ref, w2_ref, b2_ref, o_ref, acc_ref):
    # Weights streamed in dim_inner slabs; f32 accumulator resident across j.
    j = pl.program_id(1)

    @pl.when(j == 0)
    def _init():
        acc_ref[...] = jnp.zeros_like(acc_ref)

    x = x_ref[...].astype(w1_ref.dtype)
    h = jnp.dot(x, w1_ref[...], preferred_element_type=jnp.float32) + b1_ref[...]
    h = jnp.maximum(h, 0.0).astype(w2_ref.dtype)
    acc_ref[...] += jnp.dot(h, w2_ref[...], preferred_element_type=jnp.float32)

    @pl.when(j == pl.num_programs(1) - 1)
    def _finalize():
        o_ref[...] = (acc_ref[...] + b2_ref[...]).astype(o_ref.dtype)


# ---------------------------------------------------------------------------
# One-time parameter preparation (hoisted out of the per-call path)
# ---------------------------------------------------------------------------
def prepare_ffn_params(w1, b1, w2, b2, *, compute_dtype=None):
    """Pad + cast the FFN weights ONCE.  w1:(dm,di) b1:(di,) w2:(di,dm) b2:(dm,)."""
    dim_model, dim_inner = w1.shape
    lane_align, _ = _tpu_traits()
    dtype = jnp.dtype(compute_dtype) if compute_dtype is not None else jnp.dtype(w1.dtype)

    # Skip activation-side padding entirely when dim_model is already 128-aligned.
    dm_p = dim_model if dim_model % 128 == 0 else _round_up(dim_model, lane_align)
    di_p = _round_up(dim_inner, lane_align)

    w1p = jnp.pad(w1.astype(dtype), ((0, dm_p - dim_model), (0, di_p - dim_inner)))
    w2p = jnp.pad(w2.astype(dtype), ((0, di_p - dim_inner), (0, dm_p - dim_model)))
    b1p = jnp.pad(b1.astype(jnp.float32).reshape(1, dim_inner),
                  ((0, 0), (0, di_p - dim_inner)))
    b2p = jnp.pad(b2.astype(jnp.float32).reshape(1, dim_model),
                  ((0, 0), (0, dm_p - dim_model)))
    return (w1p, b1p, w2p, b2p)


# ---------------------------------------------------------------------------
# Forward (traced under jit; no host syncs, no fallback re-traces)
# ---------------------------------------------------------------------------
def _ffn_forward(params, x, *, tm_default=256):
    w1p, b1p, w2p, b2p = params
    dm_p, di_p = w1p.shape
    dim_model = x.shape[-1]
    lead = x.shape[:-1]
    M = math.prod(lead) if lead else 1

    x2d = x.reshape(M, dim_model)
    if dm_p != dim_model:
        x2d = jnp.pad(x2d, ((0, 0), (0, dm_p - dim_model)))

    lane_align, vmem_usable = _tpu_traits()
    use_single_buf = _single_buffer_weights_supported()
    cdtype = w1p.dtype
    w_item = jnp.dtype(cdtype).itemsize
    x_item = jnp.dtype(x.dtype).itemsize

    # Token tile: keep >=2 (target >=4) grid steps so megacore + DMA pipeline work.
    tm = max(8, min(_round_up(tm_default, 8), _round_up(pl.cdiv(M, 4), 8)))
    m_steps = pl.cdiv(M, tm)

    # dim_inner tiling decision.
    wbuf = 1 if use_single_buf else 2
    act_bytes = 2 * tm * dm_p * (x_item + x_item)        # x + out tiles, double-buffered
    acc_bytes = tm * dm_p * 4
    weight_budget = max(vmem_usable - act_bytes - acc_bytes - 8 * _MIB, 4 * _MIB)

    resident_weight_bytes = wbuf * 2 * dm_p * di_p * w_item
    if resident_weight_bytes <= weight_budget:
        tdi = di_p
    else:
        # Largest divisor of di_p (in lane_align units) whose double-buffered
        # W1/W2 slabs fit the budget.
        per_unit = 2 * 2 * dm_p * lane_align * w_item
        n_units = di_p // lane_align
        max_units = max(1, int(weight_budget // per_unit))
        units = 1
        for d in range(min(n_units, max_units), 0, -1):
            if n_units % d == 0:
                units = d
                break
        tdi = units * lane_align
    di_steps = di_p // tdi

    if di_steps == 1:
        need = (wbuf * 2 * dm_p * di_p * w_item + wbuf * (di_p + dm_p) * 4
                + act_bytes + tm * di_p * 4)
        w_kw = dict(pipeline_mode=pl.Buffered(1)) if use_single_buf else {}
        grid = (m_steps,)
        in_specs = [
            pl.BlockSpec((tm, dm_p), lambda i: (i, 0)),
            pl.BlockSpec((dm_p, di_p), lambda i: (0, 0), **w_kw),
            pl.BlockSpec((1, di_p), lambda i: (0, 0), **w_kw),
            pl.BlockSpec((di_p, dm_p), lambda i: (0, 0), **w_kw),
            pl.BlockSpec((1, dm_p), lambda i: (0, 0), **w_kw),
        ]
        out_specs = pl.BlockSpec((tm, dm_p), lambda i: (i, 0))
        kernel = _ffn_kernel_resident
        scratch_shapes = ()
        dim_sem = ("parallel",)
    else:
        need = (2 * 2 * dm_p * tdi * w_item + 2 * (tdi + dm_p) * 4
                + act_bytes + acc_bytes + tm * tdi * 4)
        grid = (m_steps, di_steps)
        in_specs = [
            pl.BlockSpec((tm, dm_p), lambda i, j: (i, 0)),
            pl.BlockSpec((dm_p, tdi), lambda i, j: (0, j)),
            pl.BlockSpec((1, tdi), lambda i, j: (0, j)),
            pl.BlockSpec((tdi, dm_p), lambda i, j: (j, 0)),
            pl.BlockSpec((1, dm_p), lambda i, j: (0, 0)),
        ]
        out_specs = pl.BlockSpec((tm, dm_p), lambda i, j: (i, 0))
        kernel = _ffn_kernel_di_tiled
        scratch_shapes = (pltpu.VMEM((tm, dm_p), jnp.float32),)
        dim_sem = ("parallel", "arbitrary")

    vmem_limit = int(min(vmem_usable, max(need * 3 // 2, 32 * _MIB)))
    flops = 4 * M * dm_p * di_p
    bytes_accessed = (2 * M * dm_p * x_item
                      + (w1p.size + w2p.size) * w_item
                      + (b1p.size + b2p.size) * 4)

    out2d = pl.pallas_call(
        kernel,
        out_shape=jax.ShapeDtypeStruct((M, dm_p), x.dtype),
        grid_spec=pltpu.PrefetchScalarGridSpec(
            num_scalar_prefetch=0,
            grid=grid,
            in_specs=in_specs,
            out_specs=out_specs,
            scratch_shapes=scratch_shapes,
        ),
        compiler_params=pltpu.CompilerParams(
            dimension_semantics=dim_sem,
            vmem_limit_bytes=vmem_limit,
        ),
        cost_estimate=pl.CostEstimate(
            flops=flops, transcendentals=0, bytes_accessed=bytes_accessed),
    )(x2d, w1p, b1p, w2p, b2p)

    if dm_p != dim_model:
        out2d = out2d[:, :dim_model]
    return out2d.reshape(*lead, dim_model)


def make_position_wise_feed_forward(w1, b1, w2, b2, *, compute_dtype=None, tm=256):
    """Prepare weights once and return a jitted forward: x -> FFN(x)."""
    params = prepare_ffn_params(w1, b1, w2, b2, compute_dtype=compute_dtype)
    _tpu_traits()
    _single_buffer_weights_supported()   # warm one-time caches outside the hot path

    @jax.jit
    def forward(p, x):
        return _ffn_forward(p, x, tm_default=tm)

    return functools.partial(forward, params)


if __name__ == "__main__":
    # Small shapes consistent with the module's forward:
    # x: (batch=2, seq=8, dim_model=32), dim_inner_hidden=64
    batch, seq = 2, 8
    dim_model, dim_inner_hidden = 32, 64

    key = jax.random.PRNGKey(0)
    kx, kw1, kb1, kw2, kb2 = jax.random.split(key, 5)

    x = jax.random.normal(kx, (batch, seq, dim_model), dtype=jnp.float32)
    # Deterministic init (roughly nn.Linear scale 1/sqrt(fan_in)); (in, out) layout.
    w1 = jax.random.uniform(kw1, (dim_model, dim_inner_hidden), jnp.float32,
                            -1.0, 1.0) / jnp.sqrt(dim_model)
    b1 = jax.random.uniform(kb1, (dim_inner_hidden,), jnp.float32,
                            -1.0, 1.0) / jnp.sqrt(dim_model)
    w2 = jax.random.uniform(kw2, (dim_inner_hidden, dim_model), jnp.float32,
                            -1.0, 1.0) / jnp.sqrt(dim_inner_hidden)
    b2 = jax.random.uniform(kb2, (dim_model,), jnp.float32,
                            -1.0, 1.0) / jnp.sqrt(dim_inner_hidden)

    # f32 path: weights prepared once, forward is a single async-dispatch jit call.
    ffn_f32 = make_position_wise_feed_forward(w1, b1, w2, b2)
    out = jax.block_until_ready(ffn_f32(x))
    ref = jnp.maximum(x @ w1 + b1, 0.0) @ w2 + b2
    assert out.shape == (batch, seq, dim_model)
    assert jnp.allclose(out, ref, atol=1e-5, rtol=1e-5)

    # bf16 path: the intended high-throughput configuration on v6e/v7x.
    xb = x.astype(jnp.bfloat16)
    ffn_bf16 = make_position_wise_feed_forward(w1, b1, w2, b2,
                                               compute_dtype=jnp.bfloat16)
    outb = jax.block_until_ready(ffn_bf16(xb))
    w1b = w1.astype(jnp.bfloat16).astype(jnp.float32)
    w2b = w2.astype(jnp.bfloat16).astype(jnp.float32)
    refb = jnp.maximum(xb.astype(jnp.float32) @ w1b + b1, 0.0) @ w2b + b2
    assert outb.shape == (batch, seq, dim_model) and outb.dtype == jnp.bfloat16
    assert jnp.allclose(outb.astype(jnp.float32), refb, atol=1e-1, rtol=1e-1)

    print("KERNEL_OK")
</pallas_src>

<mosaic_0001>
module attributes {stable_mosaic.version = 11 : i64} {
  func.func @_copy(%arg0: i32, %arg1: memref<8x128xf32, #tpu.memory_space<vmem>>, %arg2: memref<8x128xf32, #tpu.memory_space<vmem>>) attributes {dimension_semantics = [#tpu.dimension_semantics<arbitrary>], iteration_bounds = array<i64: 1>, scalar_prefetch = 0 : i64, scratch_operands = 0 : i64, tpu.core_type = #tpu.core_type<tc>, window_params = [{pipeline_mode = #tpu.pipeline_mode<synchronous>, transform_indices = @transform_0, window_bounds = array<i64: 8, 128>}, {pipeline_mode = #tpu.pipeline_mode<synchronous>, transform_indices = @transform_1, window_bounds = array<i64: 8, 128>}]} {
    %c0 = arith.constant 0 : index
    %c0_0 = arith.constant 0 : index
    %0 = vector.load %arg1[%c0, %c0_0] : memref<8x128xf32, #tpu.memory_space<vmem>>, vector<8x128xf32>
    %c0_1 = arith.constant 0 : index
    %c0_2 = arith.constant 0 : index
    %1 = vector.load %arg2[%c0_1, %c0_2] : memref<8x128xf32, #tpu.memory_space<vmem>>, vector<8x128xf32>
    tpu.vector_store %arg2[%c0_1, %c0_2], %0 {strides = array<i32>} : memref<8x128xf32, #tpu.memory_space<vmem>>, vector<8x128xf32>,
    return
  }
  func.func @transform_0(%arg0: i32) -> (i32, i32) {
    %c0_i32 = arith.constant 0 : i32
    %c0_i32_0 = arith.constant 0 : i32
    %c0_i32_1 = arith.constant 0 : i32
    return %c0_i32, %c0_i32_0 : i32, i32
  }
  func.func @transform_1(%arg0: i32) -> (i32, i32) {
    %c0_i32 = arith.constant 0 : i32
    %c0_i32_0 = arith.constant 0 : i32
    %c0_i32_1 = arith.constant 0 : i32
    return %c0_i32, %c0_i32_0 : i32, i32
  }
}

module attributes {stable_mosaic.version = 11 : i64} {
  func.func @_ffn_kernel_resident(%arg0: i32, %arg1: memref<8x256xf32, #tpu.memory_space<vmem>>, %arg2: memref<256x256xf32, #tpu.memory_space<vmem>>, %arg3: memref<1x256xf32, #tpu.memory_space<vmem>>, %arg4: memref<256x256xf32, #tpu.memory_space<vmem>>, %arg5: memref<1x256xf32, #tpu.memory_space<vmem>>, %arg6: memref<8x256xf32, #tpu.memory_space<vmem>>) attributes {dimension_semantics = [#tpu.dimension_semantics<parallel>], iteration_bounds = array<i64: 2>, scalar_prefetch = 0 : i64, scratch_operands = 0 : i64, tpu.core_type = #tpu.core_type<tc>, window_params = [{transform_indices = @transform_0, window_bounds = array<i64: 8, 256>}, {pipeline_mode = #tpu.pipeline_mode<synchronous>, transform_indices = @transform_1, window_bounds = array<i64: 256, 256>}, {pipeline_mode = #tpu.pipeline_mode<synchronous>, transform_indices = @transform_2, window_bounds = array<i64: 1, 256>}, {pipeline_mode = #tpu.pipeline_mode<synchronous>, transform_indices = @transform_3, window_bounds = array<i64: 256, 256>}, {pipeline_mode = #tpu.pipeline_mode<synchronous>, transform_indices = @transform_4, window_bounds = array<i64: 1, 256>}, {transform_indices = @transform_5, window_bounds = array<i64: 8, 256>}]} {
    %c0 = arith.constant 0 : index
    %c0_0 = arith.constant 0 : index
    %0 = vector.load %arg1[%c0, %c0_0] : memref<8x256xf32, #tpu.memory_space<vmem>>, vector<8x256xf32>
    %c0_1 = arith.constant 0 : index
    %c0_2 = arith.constant 0 : index
    %1 = vector.load %arg2[%c0_1, %c0_2] : memref<256x256xf32, #tpu.memory_space<vmem>>, vector<256x256xf32>
    %cst = arith.constant dense<0.000000e+00> : vector<8x256xf32>
    %2 = tpu.matmul %0, %1, %cst {dimension_numbers = #tpu.dot_dimension_numbers<[1], [0], [0], [1], [0, 0, 1, 1], [], []>} : vector<8x256xf32>, vector<256x256xf32>, vector<8x256xf32> -> vector<8x256xf32>
    %c0_3 = arith.constant 0 : index
    %c0_4 = arith.constant 0 : index
    %3 = vector.load %arg3[%c0_3, %c0_4] : memref<1x256xf32, #tpu.memory_space<vmem>>, vector<1x256xf32>
    %4 = vector.broadcast %3 : vector<1x256xf32> to vector<8x256xf32>
    %5 = arith.addf %2, %4 : vector<8x256xf32>
    %cst_5 = arith.constant 0.000000e+00 : f32
    %6 = vector.broadcast %cst_5 : f32 to vector<8x256xf32>
    %7 = arith.maximumf %5, %6 : vector<8x256xf32>
    %c0_6 = arith.constant 0 : index
    %c0_7 = arith.constant 0 : index
    %8 = vector.load %arg4[%c0_6, %c0_7] : memref<256x256xf32, #tpu.memory_space<vmem>>, vector<256x256xf32>
    %cst_8 = arith.constant dense<0.000000e+00> : vector<8x256xf32>
    %9 = tpu.matmul %7, %8, %cst_8 {dimension_numbers = #tpu.dot_dimension_numbers<[1], [0], [0], [1], [0, 0, 1, 1], [], []>} : vector<8x256xf32>, vector<256x256xf32>, vector<8x256xf32> -> vector<8x256xf32>
    %c0_9 = arith.constant 0 : index
    %c0_10 = arith.constant 0 : index
    %10 = vector.load %arg5[%c0_9, %c0_10] : memref<1x256xf32, #tpu.memory_space<vmem>>, vector<1x256xf32>
    %11 = vector.broadcast %10 : vector<1x256xf32> to vector<8x256xf32>
    %12 = arith.addf %9, %11 : vector<8x256xf32>
    %c0_11 = arith.constant 0 : index
    %c0_12 = arith.constant 0 : index
    %13 = vector.load %arg6[%c0_11, %c0_12] : memref<8x256xf32, #tpu.memory_space<vmem>>, vector<8x256xf32>
    tpu.vector_store %arg6[%c0_11, %c0_12], %12 {strides = array<i32>} : memref<8x256xf32, #tpu.memory_space<vmem>>, vector<8x256xf32>,
    return
  }
  func.func @transform_0(%arg0: i32) -> (i32, i32) {
    %c0_i32 = arith.constant 0 : i32
    %c0_i32_0 = arith.constant 0 : i32
    return %arg0, %c0_i32 : i32, i32
  }
  func.func @transform_1(%arg0: i32) -> (i32, i32) {
    %c0_i32 = arith.constant 0 : i32
    %c0_i32_0 = arith.constant 0 : i32
    %c0_i32_1 = arith.constant 0 : i32
    return %c0_i32, %c0_i32_0 : i32, i32
  }
  func.func @transform_2(%arg0: i32) -> (i32, i32) {
    %c0_i32 = arith.constant 0 : i32
    %c0_i32_0 = arith.constant 0 : i32
    %c0_i32_1 = arith.constant 0 : i32
    return %c0_i32, %c0_i32_0 : i32, i32
  }
  func.func @transform_3(%arg0: i32) -> (i32, i32) {
    %c0_i32 = arith.constant 0 : i32
    %c0_i32_0 = arith.constant 0 : i32
    %c0_i32_1 = arith.constant 0 : i32
    return %c0_i32, %c0_i32_0 : i32, i32
  }
  func.func @transform_4(%arg0: i32) -> (i32, i32) {
    %c0_i32 = arith.constant 0 : i32
    %c0_i32_0 = arith.constant 0 : i32
    %c0_i32_1 = arith.constant 0 : i32
    return %c0_i32, %c0_i32_0 : i32, i32
  }
  func.func @transform_5(%arg0: i32) -> (i32, i32) {
    %c0_i32 = arith.constant 0 : i32
    %c0_i32_0 = arith.constant 0 : i32
    return %arg0, %c0_i32 : i32, i32
  }
}

</mosaic_0001>

<bundles_post_ra>
// kernel: tpu_custom_call.1
= control target key start
LH: loop header
LB: loop body
LE: loop exit
PB: predicated region body
PF: predicated region fallthrough
CT: control target
= control target key end

     0   :  { %6 = vsyncpa [#allocation3], 0  ;;  %s114_s0 = inlined_call_operand.hbm [shape: f32[8,128], index: 0, kind: input, shape index: {}]   ;;  %s115_s1 = inlined_call_operand.hbm [shape: f32[8,128], index: 1, kind: output, shape index: {}]  }
   0x1   :  { %7 = vsyncpa [#allocation4], 0  ;;  %s13_s8 = sshll.u32 %s114_s0, 4  ;;  %s96_s9 = smov [#allocation2]   ;;  %s14_s8 = int_to_ptr.hbm [resolvable:$true] %s13_s8 }
   0x2   :  { %s15_s10 = sshll.u32 %s96_s9, 4  ;;  %s16_s10 = int_to_ptr.vmem [resolvable:$true] %s15_s10 }
   0x3   :  { %18 = dma.hbm_to_vmem [thread:$0]  %s14_s8, 128, %s16_s10, [#allocation3]  }
   0x4   :  { %92 = dma.done.wait [#allocation3], 128  }
   0x5   :  { %93 = vsyncadd [#allocation3], 4294967168  ;;  %s97_s11 = smov [#allocation5]   ;;  %s32_s15 = sshll.u32 %s115_s1, 4  ;;  %v23_v0 = vld [vmem:[#allocation2] sm:$0xff]  ;;  %s33_s15 = int_to_ptr.hbm [resolvable:$true] %s32_s15 }
   0x6   :  { %s30_s12 = sshll.u32 %s97_s11, 4  ;;  %24 = vst [vmem:[#allocation5] sm:$0xff] %v23_v0  ;;  %s31_s12 = int_to_ptr.vmem [resolvable:$true] %s30_s12 }
   0x7   :  { %35 = dma.vmem_to_hbm [thread:$0]  %s31_s12, 128, %s33_s15, [#allocation4]  }
   0x8   :  { %94 = dma.done.wait [#allocation4], 128  }
   0x9   :  { %95 = vsyncadd [#allocation4], 4294967168 }
   0xa   :  { %40 = vsyncpa [#allocation3], 1 }
   0xb   :  { %41 = vsyncpa [#allocation4], 1 }

// kernel: forward.1
= control target key start
LH: loop header
LB: loop body
LE: loop exit
PB: predicated region body
PF: predicated region fallthrough
CT: control target
= control target key end

     0   :  { %10 = vsyncpa [#allocation3], 0  ;;  %s861_s0 = inlined_call_operand.vmem [shape: f32[16,256], index: 0, kind: input, shape index: {}]   ;;  %s862_s1 = inlined_call_operand.hbm [shape: f32[256,256], index: 1, kind: input, shape index: {}]   ;;  %s863_s2 = inlined_call_operand.vmem [shape: f32[1,256], index: 2, kind: input, shape index: {}]   ;;  %s864_s3 = inlined_call_operand.hbm [shape: f32[256,256], index: 3, kind: input, shape index: {}]   ;;  %s865_s4 = inlined_call_operand.vmem [shape: f32[1,256], index: 4, kind: input, shape index: {}]   ;;  %s866_s5 = inlined_call_operand.vmem [shape: f32[16,256], index: 5, kind: output, shape index: {}]  }
   0x1   :  { %11 = vsyncpa [#allocation5], 0  ;;  %s800_s18 = smov 0  }
   0x2 LB: > { %s169_s21 = sshll.u32 %s862_s1, 4  ;;  %s809_s22 = sadd.s32 4294967295, %s764_s18   ;;  %s764_s18 = sphi %s800_s18, %s17_s18   ;;  %s170_s21 = int_to_ptr.hbm [resolvable:$true] %s169_s21 }
   0x3   : > { %p644_p0 = scmp.ge.s32.totalorder %s764_s18, 1  ;;  %p158_p1 = scmp.lt.s32.totalorder %s764_s18, 3 }
   0x4   : > { %p674_p2 = scmp.eq.s32.totalorder %s809_s22, 0  ;;  %s766_s24 = smov [#allocation2]  }
   0x5   : > { %p814_p3 = pnand %p644_p0, %p158_p1  ;;  %s171_s25 = sshll.u32 %s766_s24, 4  ;;  %s172_s25 = int_to_ptr.vmem [resolvable:$true] %s171_s25 }
   0x6   : > { %s186_s28 = sshll.u32 %s864_s3, 4  ;;  %s767_s29 = smov [#allocation4]   ;;  %s187_s28 = int_to_ptr.hbm [resolvable:$true] %s186_s28 }
   0x7   : > { %p667_p4 = pneg %p814_p3  ;;  %s188_s30 = sshll.u32 %s767_s29, 4  ;;  %s189_s30 = int_to_ptr.vmem [resolvable:$true] %s188_s30 }
   0x8   : > { %s768_s6 = smov 256   ;;  %s769_s7 = smov 16  }
   0x9   : > { %p668_p5 = pnand %p674_p2, %p667_p4  ;;  %215 = sbr.rel (%p814_p3) target bundleno = 322 (0x142), region = 40 }
   0xb   : > { %670 = dma.hbm_to_vmem [thread:$0]  (!%p668_p5), %s170_s21, 8192, %s172_s25, [#allocation3], %s768_s6, %s768_s6, %s769_s7  }
   0xc   : > { %673 = dma.hbm_to_vmem [thread:$0]  (!%p668_p5), %s187_s28, 8192, %s189_s30, [#allocation5], %s768_s6, %s768_s6, %s769_s7  }
   0xe   : > { %755 = dma.done.wait (%p674_p2), [#allocation3], 8192  }
   0xf   : > { %757 = vsyncadd (%p674_p2), [#allocation3], 4294959104 }
  0x10   : > { %759 = dma.done.wait (%p674_p2), [#allocation5], 8192  }
  0x11   : > { %761 = vsyncadd (%p674_p2), [#allocation5], 4294959104  ;;  %v292_v0 = vld [vmem:[#allocation2 + $0xf8] sm:$0xff]  ;;  %v290_v1 = vld [vmem:[#allocation2 + $0xe8] sm:$0xff]  ;;  %p249_p6 = scmp.lt.s32.totalorder %s809_s22, 1 }
  0x12   : > { %v324_v2 = vld [vmem:[#allocation2 + $0x1f8] sm:$0xff]  ;;  %371 = vmatpush.msra.mxu2 %v292_v0  ;;  %v291_v3 = vld [vmem:[#allocation2 + $0xf0] sm:$0xff]  ;;  %v322_v4 = vld [vmem:[#allocation2 + $0x1e8] sm:$0xff] }
  0x13   : > { %391 = vmatpush.msra.mxu3 %v324_v2  ;;  %331 = vmatpush.msra.mxu0 %v291_v3  ;;  %v288_v5 = vld [vmem:[#allocation2 + $0xd8] sm:$0xff]  ;;  %v289_v6 = vld [vmem:[#allocation2 + $0xe0] sm:$0xff]  ;;  %v323_v7 = vld [vmem:[#allocation2 + $0x1f0] sm:$0xff]  ;;  %s869_s22 = smov (!%p249_p6, %s809_s22), 1 }
  0x14   : > { %372 = vmatpush.msra.mxu2 %v290_v1  ;;  %v320_v8 = vld [vmem:[#allocation2 + $0x1d8] sm:$0xff]  ;;  %v287_v9 = vld [vmem:[#allocation2 + $0xd0] sm:$0xff]  ;;  %v321_v10 = vld [vmem:[#allocation2 + $0x1e0] sm:$0xff]  ;;  %351 = vmatpush.msra.mxu1 %v323_v7  ;;  %s657_s8 = sshll.u32 %s869_s22, 4 }
  0x15   : > { %392 = vmatpush.msra.mxu3 %v322_v4  ;;  %332 = vmatpush.msra.mxu0 %v289_v6  ;;  %v286_v11 = vld [vmem:[#allocation2 + $0xc8] sm:$0xff]  ;;  %v285_v13 = vld [vmem:[#allocation2 + $0xc0] sm:$0xff]  ;;  %v319_v14 = vld [vmem:[#allocation2 + $0x1d0] sm:$0xff]  ;;  %s253_s11 = scalar_lea.vmem %s861_s0, %s657_s8  ;;  %s258_s19 = scalar_lea.vmem %s866_s5, %s657_s8 }
  0x16   : > { %v318_v12 = vld [vmem:[#allocation2 + $0x1c8] sm:$0xff]  ;;  %373 = vmatpush.msra.mxu2 %v288_v5  ;;  %352 = vmatpush.msra.mxu1 %v321_v10  ;;  %v284_v15 = vld [vmem:[#allocation2 + $0xb8] sm:$0xff]  ;;  %v283_v17 = vld [vmem:[#allocation2 + $0xb0] sm:$0xff] }
  0x17   : > { %393 = vmatpush.msra.mxu3 %v320_v8  ;;  %333 = vmatpush.msra.mxu0 %v287_v9  ;;  %v316_v16 = vld [vmem:[#allocation2 + $0x1b8] sm:$0xff]  ;;  %v317_v18 = vld [vmem:[#allocation2 + $0x1c0] sm:$0xff]  ;;  %v282_v19 = vld [vmem:[#allocation2 + $0xa8] sm:$0xff] }
  0x18   : > { %374 = vmatpush.msra.mxu2 %v286_v11  ;;  %353 = vmatpush.msra.mxu1 %v319_v14  ;;  %v314_v20 = vld [vmem:[#allocation2 + $0x1a8] sm:$0xff]  ;;  %v281_v21 = vld [vmem:[#allocation2 + $0xa0] sm:$0xff]  ;;  %v315_v22 = vld [vmem:[#allocation2 + $0x1b0] sm:$0xff] }
  0x19   : > { %394 = vmatpush.msra.mxu3 %v318_v12  ;;  %334 = vmatpush.msra.mxu0 %v285_v13  ;;  %v280_v23 = vld [vmem:[#allocation2 + $0x98] sm:$0xff]  ;;  %v279_v25 = vld [vmem:[#allocation2 + $0x90] sm:$0xff]  ;;  %v313_v26 = vld [vmem:[#allocation2 + $0x1a0] sm:$0xff] }
  0x1a   : > { %375 = vmatpush.msra.mxu2 %v284_v15  ;;  %354 = vmatpush.msra.mxu1 %v317_v18  ;;  %v312_v24 = vld [vmem:[#allocation2 + $0x198] sm:$0xff]  ;;  %v278_v27 = vld [vmem:[#allocation2 + $0x88] sm:$0xff]  ;;  %v277_v29 = vld [vmem:[#allocation2 + $0x80] sm:$0xff] }
  0x1b   : > { %395 = vmatpush.msra.mxu3 %v316_v16  ;;  %335 = vmatpush.msra.mxu0 %v283_v17  ;;  %v310_v28 = vld [vmem:[#allocation2 + $0x188] sm:$0xff]  ;;  %v311_v30 = vld [vmem:[#allocation2 + $0x190] sm:$0xff]  ;;  %v276_v31 = vld [vmem:[#allocation2 + $0x78] sm:$0xff] }
  0x1c   : > { %376 = vmatpush.msra.mxu2 %v282_v19  ;;  %355 = vmatpush.msra.mxu1 %v315_v22  ;;  %v308_v32 = vld [vmem:[#allocation2 + $0x178] sm:$0xff]  ;;  %v275_v33 = vld [vmem:[#allocation2 + $0x70] sm:$0xff]  ;;  %v309_v34 = vld [vmem:[#allocation2 + $0x180] sm:$0xff] }
  0x1d   : > { %396 = vmatpush.msra.mxu3 %v314_v20  ;;  %336 = vmatpush.msra.mxu0 %v281_v21  ;;  %v274_v35 = vld [vmem:[#allocation2 + $0x68] sm:$0xff]  ;;  %v273_v37 = vld [vmem:[#allocation2 + $0x60] sm:$0xff]  ;;  %v307_v38 = vld [vmem:[#allocation2 + $0x170] sm:$0xff] }
  0x1e   : > { %377 = vmatpush.msra.mxu2 %v280_v23  ;;  %356 = vmatpush.msra.mxu1 %v313_v26  ;;  %v306_v36 = vld [vmem:[#allocation2 + $0x168] sm:$0xff]  ;;  %v272_v39 = vld [vmem:[#allocation2 + $0x58] sm:$0xff]  ;;  %v271_v41 = vld [vmem:[#allocation2 + $0x50] sm:$0xff] }
  0x1f   : > { %397 = vmatpush.msra.mxu3 %v312_v24  ;;  %337 = vmatpush.msra.mxu0 %v279_v25  ;;  %v304_v40 = vld [vmem:[#allocation2 + $0x158] sm:$0xff]  ;;  %v305_v42 = vld [vmem:[#allocation2 + $0x160] sm:$0xff]  ;;  %v270_v43 = vld [vmem:[#allocation2 + $0x48] sm:$0xff] }
  0x20   : > { %378 = vmatpush.msra.mxu2 %v278_v27  ;;  %357 = vmatpush.msra.mxu1 %v311_v30  ;;  %v302_v44 = vld [vmem:[#allocation2 + $0x148] sm:$0xff]  ;;  %v269_v45 = vld [vmem:[#allocation2 + $0x40] sm:$0xff]  ;;  %v303_v46 = vld [vmem:[#allocation2 + $0x150] sm:$0xff] }
  0x21   : > { %398 = vmatpush.msra.mxu3 %v310_v28  ;;  %338 = vmatpush.msra.mxu0 %v277_v29  ;;  %v268_v47 = vld [vmem:[#allocation2 + $0x38] sm:$0xff]  ;;  %v267_v49 = vld [vmem:[#allocation2 + $0x30] sm:$0xff]  ;;  %v301_v50 = vld [vmem:[#allocation2 + $0x140] sm:$0xff] }
  0x22   : > { %379 = vmatpush.msra.mxu2 %v276_v31  ;;  %358 = vmatpush.msra.mxu1 %v309_v34  ;;  %v300_v48 = vld [vmem:[#allocation2 + $0x138] sm:$0xff]  ;;  %v266_v51 = vld [vmem:[#allocation2 + $0x28] sm:$0xff]  ;;  %v265_v53 = vld [vmem:[#allocation2 + $0x20] sm:$0xff] }
  0x23   : > { %399 = vmatpush.msra.mxu3 %v308_v32  ;;  %339 = vmatpush.msra.mxu0 %v275_v33  ;;  %v298_v52 = vld [vmem:[#allocation2 + $0x128] sm:$0xff]  ;;  %v299_v54 = vld [vmem:[#allocation2 + $0x130] sm:$0xff]  ;;  %v264_v55 = vld [vmem:[#allocation2 + $0x18] sm:$0xff] }
  0x24   : > { %380 = vmatpush.msra.mxu2 %v274_v35  ;;  %359 = vmatpush.msra.mxu1 %v307_v38  ;;  %v296_v56 = vld [vmem:[#allocation2 + $0x118] sm:$0xff]  ;;  %v263_v57 = vld [vmem:[#allocation2 + $0x10] sm:$0xff]  ;;  %v297_v58 = vld [vmem:[#allocation2 + $0x120] sm:$0xff] }
  0x25   : > { %400 = vmatpush.msra.mxu3 %v306_v36  ;;  %340 = vmatpush.msra.mxu0 %v273_v37  ;;  %v262_v59 = vld [vmem:[#allocation2 + $0x8] sm:$0xff]  ;;  %v259_v61 = vld [vmem:[%s253_s11] sm:$0xff]  ;;  %v295_v0 = vld [vmem:[#allocation2 + $0x110] sm:$0xff] }
  0x26   : > { %381 = vmatpush.msra.mxu2 %v272_v39  ;;  %360 = vmatpush.msra.mxu1 %v305_v42  ;;  %v294_v60 = vld [vmem:[#allocation2 + $0x108] sm:$0xff]  ;;  %v261_v63 = vld [vmem:[#allocation2] sm:$0xff]  ;;  %v444_v1 = vld [vmem:[#allocation4 + $0xf8] sm:$0xff] }
  0x27   : > { %401 = vmatpush.msra.mxu3 %v304_v40  ;;  %341 = vmatpush.msra.mxu0 %v271_v41  ;;  %v260_v62 = vld [vmem:[%s253_s11 + $0x8] sm:$0xff]  ;;  %v293_v2 = vld [vmem:[#allocation2 + $0x100] sm:$0xff]  ;;  %v443_v3 = vld [vmem:[#allocation4 + $0xf0] sm:$0xff] }
  0x28   : > { %382 = vmatpush.msra.mxu2 %v270_v43  ;;  %361 = vmatpush.msra.mxu1 %v303_v46  ;;  %v442_v4 = vld [vmem:[#allocation4 + $0xe8] sm:$0xff]  ;;  %v441_v5 = vld [vmem:[#allocation4 + $0xe0] sm:$0xff]  ;;  %v475_v6 = vld [vmem:[#allocation4 + $0x1f0] sm:$0xff] }
  0x29   : > { %402 = vmatpush.msra.mxu3 %v302_v44  ;;  %342 = vmatpush.msra.mxu0 %v269_v45  ;;  %v476_v7 = vld [vmem:[#allocation4 + $0x1f8] sm:$0xff]  ;;  %v439_v9 = vld [vmem:[#allocation4 + $0xd0] sm:$0xff]  ;;  %v473_v10 = vld [vmem:[#allocation4 + $0x1e0] sm:$0xff] }
  0x2a   : > { %383 = vmatpush.msra.mxu2 %v268_v47  ;;  %362 = vmatpush.msra.mxu1 %v301_v50  ;;  %v440_v8 = vld [vmem:[#allocation4 + $0xd8] sm:$0xff]  ;;  %v474_v11 = vld [vmem:[#allocation4 + $0x1e8] sm:$0xff]  ;;  %v437_v13 = vld [vmem:[#allocation4 + $0xc0] sm:$0xff] }
  0x2b   : > { %403 = vmatpush.msra.mxu3 %v300_v48  ;;  %343 = vmatpush.msra.mxu0 %v267_v49  ;;  %v438_v12 = vld [vmem:[#allocation4 + $0xc8] sm:$0xff]  ;;  %v471_v14 = vld [vmem:[#allocation4 + $0x1d0] sm:$0xff]  ;;  %v472_v15 = vld [vmem:[#allocation4 + $0x1d8] sm:$0xff] }
  0x2c   : > { %384 = vmatpush.msra.mxu2 %v266_v51  ;;  %363 = vmatpush.msra.mxu1 %v299_v54  ;;  %v436_v16 = vld [vmem:[#allocation4 + $0xb8] sm:$0xff]  ;;  %v435_v17 = vld [vmem:[#allocation4 + $0xb0] sm:$0xff]  ;;  %v469_v18 = vld [vmem:[#allocation4 + $0x1c0] sm:$0xff] }
  0x2d   : > { %404 = vmatpush.msra.mxu3 %v298_v52  ;;  %344 = vmatpush.msra.mxu0 %v265_v53  ;;  %v470_v19 = vld [vmem:[#allocation4 + $0x1c8] sm:$0xff]  ;;  %v433_v21 = vld [vmem:[#allocation4 + $0xa0] sm:$0xff]  ;;  %v467_v22 = vld [vmem:[#allocation4 + $0x1b0] sm:$0xff] }
  0x2e   : > { %385 = vmatpush.msra.mxu2 %v264_v55  ;;  %364 = vmatpush.msra.mxu1 %v297_v58  ;;  %v434_v20 = vld [vmem:[#allocation4 + $0xa8] sm:$0xff]  ;;  %v468_v23 = vld [vmem:[#allocation4 + $0x1b8] sm:$0xff]  ;;  %v431_v25 = vld [vmem:[#allocation4 + $0x90] sm:$0xff] }
  0x2f   : > { %405 = vmatpush.msra.mxu3 %v296_v56  ;;  %345 = vmatpush.msra.mxu0 %v263_v57  ;;  %v432_v24 = vld [vmem:[#allocation4 + $0x98] sm:$0xff]  ;;  %v465_v26 = vld [vmem:[#allocation4 + $0x1a0] sm:$0xff]  ;;  %v466_v27 = vld [vmem:[#allocation4 + $0x1a8] sm:$0xff] }
  0x30   : > { %386 = vmatpush.msra.mxu2 %v262_v59  ;;  %365 = vmatpush.msra.mxu1 %v295_v0  ;;  %v430_v28 = vld [vmem:[#allocation4 + $0x88] sm:$0xff]  ;;  %v429_v29 = vld [vmem:[#allocation4 + $0x80] sm:$0xff]  ;;  %v463_v30 = vld [vmem:[#allocation4 + $0x190] sm:$0xff] }
  0x31   : > { %406 = vmatpush.msra.mxu3 %v294_v60  ;;  %387 = vmatmul.f32.vlgmr.msra.gmra.mxu2 %v259_v61  ;;  %v464_v31 = vld [vmem:[#allocation4 + $0x198] sm:$0xff]  ;;  %v427_v33 = vld [vmem:[#allocation4 + $0x70] sm:$0xff]  ;;  %v461_v34 = vld [vmem:[#allocation4 + $0x180] sm:$0xff] }
  0x32   : > { %407 = vmatmul.f32.vlgmr.msra.gmra.mxu3 %v260_v62  ;;  %346 = vmatpush.msra.mxu0 %v261_v63  ;;  %v428_v32 = vld [vmem:[#allocation4 + $0x78] sm:$0xff]  ;;  %v462_v35 = vld [vmem:[#allocation4 + $0x188] sm:$0xff]  ;;  %v425_v37 = vld [vmem:[#allocation4 + $0x60] sm:$0xff] }
  0x33   : > { %347 = vmatmul.f32.vlgmr.msra.gmra.mxu0 %v259_v61  ;;  %523 = vmatpush.msrb.mxu2 %v444_v1  ;;  %v426_v36 = vld [vmem:[#allocation4 + $0x68] sm:$0xff]  ;;  %v459_v38 = vld [vmem:[#allocation4 + $0x170] sm:$0xff]  ;;  %v460_v39 = vld [vmem:[#allocation4 + $0x178] sm:$0xff] }
  0x34   : > { %366 = vmatpush.msra.mxu1 %v293_v2  ;;  %483 = vmatpush.msrb.mxu0 %v443_v3  ;;  %v424_v40 = vld [vmem:[#allocation4 + $0x58] sm:$0xff]  ;;  %v423_v41 = vld [vmem:[#allocation4 + $0x50] sm:$0xff]  ;;  %v457_v42 = vld [vmem:[#allocation4 + $0x160] sm:$0xff] }
  0x35   : > { %367 = vmatmul.f32.vlgmr.msra.gmra.mxu1 %v260_v62  ;;  %524 = vmatpush.msrb.mxu2 %v442_v4  ;;  %v458_v43 = vld [vmem:[#allocation4 + $0x168] sm:$0xff]  ;;  %v421_v45 = vld [vmem:[#allocation4 + $0x40] sm:$0xff]  ;;  %v455_v46 = vld [vmem:[#allocation4 + $0x150] sm:$0xff] }
  0x36   : > { %484 = vmatpush.msrb.mxu0 %v441_v5  ;;  %503 = vmatpush.msrb.mxu1 %v475_v6  ;;  %v422_v44 = vld [vmem:[#allocation4 + $0x48] sm:$0xff]  ;;  %v456_v47 = vld [vmem:[#allocation4 + $0x158] sm:$0xff]  ;;  %v419_v48 = vld [vmem:[#allocation4 + $0x30] sm:$0xff] }
  0x37   : > { %543 = vmatpush.msrb.mxu3 %v476_v7  ;;  %525 = vmatpush.msrb.mxu2 %v440_v8  ;;  %v453_v49 = vld [vmem:[#allocation4 + $0x140] sm:$0xff]  ;;  %v420_v50 = vld [vmem:[#allocation4 + $0x38] sm:$0xff]  ;;  %v454_v51 = vld [vmem:[#allocation4 + $0x148] sm:$0xff] }
  0x38   : > { %485 = vmatpush.msrb.mxu0 %v439_v9  ;;  %504 = vmatpush.msrb.mxu1 %v473_v10  ;;  %v417_v52 = vld [vmem:[#allocation4 + $0x20] sm:$0xff]  ;;  %v451_v53 = vld [vmem:[#allocation4 + $0x130] sm:$0xff]  ;;  %v418_v54 = vld [vmem:[#allocation4 + $0x28] sm:$0xff] }
  0x39   : > { %544 = vmatpush.msrb.mxu3 %v474_v11  ;;  %526 = vmatpush.msrb.mxu2 %v438_v12  ;;  %v452_v55 = vld [vmem:[#allocation4 + $0x138] sm:$0xff]  ;;  %v415_v56 = vld [vmem:[#allocation4 + $0x10] sm:$0xff]  ;;  %v449_v57 = vld [vmem:[#allocation4 + $0x120] sm:$0xff] }
  0x3a   : > { %486 = vmatpush.msrb.mxu0 %v437_v13  ;;  %505 = vmatpush.msrb.mxu1 %v471_v14  ;;  %v416_v58 = vld [vmem:[#allocation4 + $0x18] sm:$0xff]  ;;  %v450_v59 = vld [vmem:[#allocation4 + $0x128] sm:$0xff]  ;;  %v413_v60 = vld [vmem:[#allocation4] sm:$0xff] }
  0x3b   : > { %545 = vmatpush.msrb.mxu3 %v472_v15  ;;  %527 = vmatpush.msrb.mxu2 %v436_v16  ;;  %v447_v61 = vld [vmem:[#allocation4 + $0x110] sm:$0xff]  ;;  %v414_v62 = vld [vmem:[#allocation4 + $0x8] sm:$0xff]  ;;  %v448_v63 = vld [vmem:[#allocation4 + $0x118] sm:$0xff] }
  0x3c   : > { %487 = vmatpush.msrb.mxu0 %v435_v17  ;;  %506 = vmatpush.msrb.mxu1 %v469_v18  ;;  %v445_v0 = vld [vmem:[#allocation4 + $0x100] sm:$0xff]  ;;  %v446_v1 = vld [vmem:[#allocation4 + $0x108] sm:$0xff] }
  0x3d   : > { %546 = vmatpush.msrb.mxu3 %v470_v19  ;;  %528 = vmatpush.msrb.mxu2 %v434_v20  ;;  %v325_v2 = vld [vmem:[%s863_s2] sm:$0x3] }
  0x3e   : > { %488 = vmatpush.msrb.mxu0 %v433_v21  ;;  %507 = vmatpush.msrb.mxu1 %v467_v22  ;;  %v327_v3 = vperm.slane %v325_v2, 0  ;;  %v328_v6 = vperm.slane %v325_v2, 1  ;;  %v477_v15 = vld [vmem:[%s865_s4] sm:$0x3] }
  0x3f   : > { %547 = vmatpush.msrb.mxu3 %v468_v23  ;;  %529 = vmatpush.msrb.mxu2 %v432_v24  ;;  %v479_v16 = vperm.slane %v477_v15, 0  ;;  %v480_v19 = vperm.slane %v477_v15, 1 }
  0x40   : > { %489 = vmatpush.msrb.mxu0 %v431_v25  ;;  %508 = vmatpush.msrb.mxu1 %v465_v26 }
  0x41   : > { %548 = vmatpush.msrb.mxu3 %v466_v27  ;;  %530 = vmatpush.msrb.mxu2 %v430_v28 }
  0x42   : > { %490 = vmatpush.msrb.mxu0 %v429_v29  ;;  %509 = vmatpush.msrb.mxu1 %v463_v30 }
  0x43   : > { %549 = vmatpush.msrb.mxu3 %v464_v31  ;;  %531 = vmatpush.msrb.mxu2 %v428_v32 }
  0x44   : > { %491 = vmatpush.msrb.mxu0 %v427_v33  ;;  %510 = vmatpush.msrb.mxu1 %v461_v34 }
  0x45   : > { %550 = vmatpush.msrb.mxu3 %v462_v35  ;;  %532 = vmatpush.msrb.mxu2 %v426_v36 }
  0x46   : > { %492 = vmatpush.msrb.mxu0 %v425_v37  ;;  %511 = vmatpush.msrb.mxu1 %v459_v38 }
  0x47   : > { %551 = vmatpush.msrb.mxu3 %v460_v39  ;;  %533 = vmatpush.msrb.mxu2 %v424_v40 }
  0x48   : > { %493 = vmatpush.msrb.mxu0 %v423_v41  ;;  %512 = vmatpush.msrb.mxu1 %v457_v42 }
  0x49   : > { %552 = vmatpush.msrb.mxu3 %v458_v43  ;;  %534 = vmatpush.msrb.mxu2 %v422_v44 }
  0x4a   : > { %494 = vmatpush.msrb.mxu0 %v421_v45  ;;  %513 = vmatpush.msrb.mxu1 %v455_v46 }
  0x4b   : > { %553 = vmatpush.msrb.mxu3 %v456_v47  ;;  %535 = vmatpush.msrb.mxu2 %v420_v50 }
  0x4c   : > { %495 = vmatpush.msrb.mxu0 %v419_v48  ;;  %514 = vmatpush.msrb.mxu1 %v453_v49 }
  0x4d   : > { %554 = vmatpush.msrb.mxu3 %v454_v51  ;;  %536 = vmatpush.msrb.mxu2 %v418_v54 }
  0x4e   : > { %496 = vmatpush.msrb.mxu0 %v417_v52  ;;  %515 = vmatpush.msrb.mxu1 %v451_v53 }
  0x4f   : > { %555 = vmatpush.msrb.mxu3 %v452_v55  ;;  %537 = vmatpush.msrb.mxu2 %v416_v58 }
  0x50   : > { %497 = vmatpush.msrb.mxu0 %v415_v56  ;;  %516 = vmatpush.msrb.mxu1 %v449_v57 }
  0x51   : > { %556 = vmatpush.msrb.mxu3 %v450_v59  ;;  %538 = vmatpush.msrb.mxu2 %v414_v62 }
  0x52   : > { %498 = vmatpush.msrb.mxu0 %v413_v60  ;;  %517 = vmatpush.msrb.mxu1 %v447_v61 }
  0x53   : > { %557 = vmatpush.msrb.mxu3 %v448_v63 }
  0x54   : > { %518 = vmatpush.msrb.mxu1 %v445_v0 }
  0x55   : > { %558 = vmatpush.msrb.mxu3 %v446_v1 }
  0xb0   : > { %v348_v4 = vpop.f32.mrf.mxu0 }
  0xb1   : > { %v349_v5 = vadd.f32 %v348_v4, %v327_v3 }
  0xb2   : > { %v368_v7 = vpop.f32.mrf.mxu1 }
  0xb3   : > { %v369_v8 = vadd.f32 %v368_v7, %v349_v5 }
  0xb4   : > { %v388_v9 = vpop.f32.mrf.mxu2 }
  0xb5   : > { %v408_v10 = vpop.f32.mrf.mxu3  ;;  %v411_v11 = vmax.f32 %v369_v8, 0.0  ;;  %v389_v12 = vadd.f32 %v388_v9, %v328_v6 }
  0xb7   : > { %v409_v13 = vadd.f32 %v408_v10, %v389_v12  ;;  %499 = vmatmul.f32.vlgmr.msrb.gmra.mxu0 %v411_v11  ;;  %539 = vmatmul.f32.vlgmr.msrb.gmra.mxu2 %v411_v11 }
  0xb9   : > { %v412_v14 = vmax.f32 %v409_v13, 0.0 }
  0xbb   : > { %519 = vmatmul.f32.vlgmr.msrb.gmra.mxu1 %v412_v14  ;;  %559 = vmatmul.f32.vlgmr.msrb.gmra.mxu3 %v412_v14 }
 0x134   : > { %v500_v17 = vpop.f32.mrf.mxu0 }
 0x135   : > { %v501_v18 = vadd.f32 %v500_v17, %v479_v16 }
 0x138   : > { %v520_v20 = vpop.f32.mrf.mxu1 }
 0x139   : > { %v521_v21 = vadd.f32 %v520_v20, %v501_v18 }
 0x13a   : > { %v540_v22 = vpop.f32.mrf.mxu2 }
 0x13b   : > { %563 = vst [vmem:[%s258_s19] sm:$0xff] %v521_v21  ;;  %v541_v23 = vadd.f32 %v540_v22, %v480_v19 }
 0x13e   : > { %v560_v24 = vpop.f32.mrf.mxu3 }
 0x13f   : > { %v561_v25 = vadd.f32 %v560_v24, %v541_v23 }
 0x141   : > { %564 = vst [vmem:[%s258_s19 + $0x8] sm:$0xff] %v561_v25 }
 0x142 PF: > { %s17_s18 = sadd.s32 1, %s764_s18  }
 0x143   : > { %p14_p7 = scmp.ge.s32.totalorder %s17_s18, 4  }
 0x145   :  { %16 = sbr.rel (!%p14_p7) target bundleno = 2 (0x2), region = 79 }
 0x14a   :  { %586 = vsyncpa [#allocation3], 1 }
 0x14b   :  { %588 = vsyncpa [#allocation3 + $0x1], 1 }
 0x14c   :  { %589 = vsyncpa [#allocation5], 1 }

</bundles_post_ra>
